<compile_context>
chip_gen: v7x
topology: tpu7x:2x2x1
jax: 0.10.0
libtpu: 0.0.40
codegen_flags: <defaults>
</compile_context>

<pallas_src>
import functools

import jax
import jax.numpy as jnp
from jax.experimental import pallas as pl
from jax.experimental.pallas import tpu as pltpu


def _round_up(x: int, m: int) -> int:
    return ((x + m - 1) // m) * m


def _sublane_align(dtype) -> int:
    # Native TPU sublane tiling: f32 -> 8, bf16 -> 16, int8/bool -> 32.
    return max(8, 32 // max(1, jnp.dtype(dtype).itemsize))


def _mask_loss_kernel(logits_ref, labels_ref, out_ref, *, true_k, inv_k, needs_col_mask):
    k = pl.program_id(1)                 # mask-pixel-tile index ("arbitrary", reduced)
    last = pl.num_programs(1) - 1

    # Cast narrow dtypes to f32 on-chip (keeps HBM traffic at the narrow width).
    x = logits_ref[...].astype(jnp.float32)
    z = labels_ref[...].astype(jnp.float32)

    # Numerically stable BCE-with-logits: max(x,0) - x*z + log1p(exp(-|x|)).
    loss = jnp.maximum(x, 0.0) - x * z + jnp.log1p(jnp.exp(-jnp.abs(x)))

    @pl.when(k == 0)
    def _init():
        out_ref[...] = jnp.zeros_like(out_ref)

    # NOTE: padded ROWS need no masking; their outputs sit at indices >= num_masks
    # and are discarded by the wrapper's per_mask[:m] slice.
    if needs_col_mask:
        # Column padding exists only on the last k tile: interior tiles take the
        # cheap path (no iota / compare / select), the boundary tile masks exactly.
        @pl.when(k < last)
        def _interior():
            out_ref[...] += jnp.sum(loss, axis=1, keepdims=True)

        @pl.when(k == last)
        def _boundary():
            tm, tk = loss.shape
            col = k * tk + jax.lax.broadcasted_iota(jnp.int32, (tm, tk), 1)
            masked = jnp.where(col < true_k, loss, 0.0)
            # mean over the mask dim == sum * (1/mask_size): one VPU multiply.
            out_ref[...] = (out_ref[...] + jnp.sum(masked, axis=1, keepdims=True)) * inv_k
    else:
        out_ref[...] += jnp.sum(loss, axis=1, keepdims=True)

        @pl.when(k == last)
        def _finalize():
            out_ref[...] = out_ref[...] * inv_k


@functools.partial(jax.jit, static_argnames=("reduction",))
def mask_loss(pred_logits, tgt_labels, reduction="mean"):
    """Pallas implementation of MaskLoss.forward with a sigmoid BCE-with-logits
    (reduction='none') inner mask loss.

    pred_logits / tgt_labels: [num_masks, *mask_dims]; any float/int/bool dtype.
    Returns f32[num_masks] for reduction='none', else an f32 scalar.
    """
    # TODO(synk): the torch module builds an arbitrary inner mask loss from
    # mask_loss_cfg via build_model; here the concrete (and most common) choice,
    # sigmoid BCE-with-logits, is implemented.
    m = pred_logits.shape[0]
    pred2 = pred_logits.reshape(m, -1)
    tgt2 = tgt_labels.reshape(m, -1)
    k = pred2.shape[1]

    # Hard 0/1 masks (bool / integer labels) travel as int8: exact and half/quarter
    # the HBM traffic of f32 labels. Float labels are left untouched.
    if jnp.issubdtype(tgt2.dtype, jnp.bool_) or jnp.issubdtype(tgt2.dtype, jnp.integer):
        tgt2 = tgt2.astype(jnp.int8)

    align_m = max(_sublane_align(pred2.dtype), _sublane_align(tgt2.dtype))

    # Mask-tile size: keep the "parallel" grid axis at extent >= 2 whenever there
    # are enough masks, so both v7x TensorCores get work.
    if m >= 2 * align_m:
        tm = min(256, _round_up(-(-m // 2), align_m))
    else:
        tm = min(256, _round_up(m, align_m))
    m_pad = _round_up(m, tm)

    # Pixel-tile size: constant block BYTES across dtypes (~4 MiB/input at tm=256).
    itemsize = max(jnp.dtype(pred2.dtype).itemsize, jnp.dtype(tgt2.dtype).itemsize)
    max_tk = (4096 * 4) // itemsize          # 4096 f32 / 8192 bf16 / 16384 int8
    tk = min(_round_up(k, 128), max_tk)
    k_pad = _round_up(k, tk)

    if (m_pad, k_pad) != (m, k):             # only hit for unfriendly shapes
        pred2 = jnp.pad(pred2, ((0, m_pad - m), (0, k_pad - k)))
        tgt2 = jnp.pad(tgt2, ((0, m_pad - m), (0, k_pad - k)))

    grid = (m_pad // tm, k_pad // tk)
    kernel = functools.partial(
        _mask_loss_kernel,
        true_k=int(k),
        inv_k=float(1.0 / k),                # Python float literal, not a captured array
        needs_col_mask=(k_pad != k),
    )

    per_mask = pl.pallas_call(
        kernel,
        out_shape=jax.ShapeDtypeStruct((m_pad, 1), jnp.float32),
        grid=grid,
        in_specs=[
            pl.BlockSpec((tm, tk), lambda i, j: (i, j)),
            pl.BlockSpec((tm, tk), lambda i, j: (i, j)),
        ],
        out_specs=pl.BlockSpec((tm, 1), lambda i, j: (i, 0)),
        compiler_params=pltpu.CompilerParams(
            dimension_semantics=("parallel", "arbitrary"),
            vmem_limit_bytes=32 * 1024 * 1024,
        ),
    )(pred2, tgt2)

    losses = per_mask[:m, 0]
    if reduction == "none":
        return losses
    elif reduction == "mean":
        return jnp.mean(losses)
    elif reduction == "sum":
        return jnp.sum(losses)
    else:
        raise ValueError(f"Invalid reduction string (got '{reduction}').")


def _reference(pred_logits, tgt_labels, reduction="mean"):
    x = pred_logits.astype(jnp.float32).reshape(pred_logits.shape[0], -1)
    z = tgt_labels.astype(jnp.float32).reshape(pred_logits.shape[0], -1)
    per_elem = jnp.maximum(x, 0.0) - x * z + jnp.log1p(jnp.exp(-jnp.abs(x)))
    losses = per_elem.mean(axis=1)
    if reduction == "none":
        return losses
    if reduction == "mean":
        return losses.mean()
    return losses.sum()


if __name__ == "__main__":
    key = jax.random.PRNGKey(0)
    k1, k2, k3, k4, k5, k6, k7, k8 = jax.random.split(key, 8)

    # Case 1: aligned shapes (8 masks of 64x64), single k tile, no masking path.
    pred = jax.random.normal(k1, (8, 64, 64), dtype=jnp.float32)
    tgt = (jax.random.uniform(k2, (8, 64, 64)) > 0.5).astype(jnp.float32)

    out_mean = mask_loss(pred, tgt, reduction="mean")
    jax.block_until_ready(out_mean)
    assert jnp.allclose(out_mean, _reference(pred, tgt, "mean"), atol=1e-5, rtol=1e-5)

    out_none = mask_loss(pred, tgt, reduction="none")
    out_sum = mask_loss(pred, tgt, reduction="sum")
    jax.block_until_ready((out_none, out_sum))
    assert jnp.allclose(out_none, _reference(pred, tgt, "none"), atol=1e-5, rtol=1e-5)
    assert jnp.allclose(out_sum, _reference(pred, tgt, "sum"), atol=1e-5, rtol=1e-5)

    # Case 2: unaligned tiny shapes (5 masks of 7x9) -> pad + boundary column mask.
    pred_u = jax.random.normal(k3, (5, 7, 9), dtype=jnp.float32)
    tgt_u = (jax.random.uniform(k4, (5, 7, 9)) > 0.5).astype(jnp.float32)
    out_u = mask_loss(pred_u, tgt_u, reduction="mean")
    out_u_none = mask_loss(pred_u, tgt_u, reduction="none")
    jax.block_until_ready((out_u, out_u_none))
    assert jnp.allclose(out_u, _reference(pred_u, tgt_u, "mean"), atol=1e-5, rtol=1e-5)
    assert jnp.allclose(out_u_none, _reference(pred_u, tgt_u, "none"), atol=1e-5, rtol=1e-5)

    # Case 3: multi-step k reduction with a masked last tile (4 masks of 96x96).
    pred_b = jax.random.normal(k5, (4, 96, 96), dtype=jnp.float32)
    tgt_b = (jax.random.uniform(k6, (4, 96, 96)) > 0.5).astype(jnp.float32)
    out_b = mask_loss(pred_b, tgt_b, reduction="none")
    jax.block_until_ready(out_b)
    assert jnp.allclose(out_b, _reference(pred_b, tgt_b, "none"), atol=1e-4, rtol=1e-5)

    # Case 4: narrow dtypes (bf16 logits, boolean labels) -> int8 label path.
    pred_n = jax.random.normal(k7, (10, 32, 32), dtype=jnp.bfloat16)
    tgt_n = jax.random.uniform(k8, (10, 32, 32)) > 0.5          # bool labels
    out_n = mask_loss(pred_n, tgt_n, reduction="mean")
    jax.block_until_ready(out_n)
    assert jnp.allclose(out_n, _reference(pred_n, tgt_n, "mean"), atol=1e-4, rtol=1e-4)

    print("KERNEL_OK")
</pallas_src>

<mosaic_0001>
module attributes {stable_mosaic.version = 11 : i64} {
  func.func @_mask_loss_kernel(%arg0: i32, %arg1: i32, %arg2: memref<8x4096xf32, #tpu.memory_space<vmem>>, %arg3: memref<8x4096xf32, #tpu.memory_space<vmem>>, %arg4: memref<8x1xf32, #tpu.memory_space<vmem>>) attributes {dimension_semantics = [#tpu.dimension_semantics<parallel>, #tpu.dimension_semantics<arbitrary>], iteration_bounds = array<i64: 1, 1>, scalar_prefetch = 0 : i64, scratch_operands = 0 : i64, tpu.core_type = #tpu.core_type<tc>, window_params = [{transform_indices = @transform_0, window_bounds = array<i64: 8, 4096>}, {transform_indices = @transform_1, window_bounds = array<i64: 8, 4096>}, {transform_indices = @transform_2, window_bounds = array<i64: 8, 1>}]} {
    %c0 = arith.constant 0 : index
    %c0_0 = arith.constant 0 : index
    %0 = vector.load %arg2[%c0, %c0_0] : memref<8x4096xf32, #tpu.memory_space<vmem>>, vector<8x4096xf32>
    %c0_1 = arith.constant 0 : index
    %c0_2 = arith.constant 0 : index
    %1 = vector.load %arg3[%c0_1, %c0_2] : memref<8x4096xf32, #tpu.memory_space<vmem>>, vector<8x4096xf32>
    %cst = arith.constant 0.000000e+00 : f32
    %2 = vector.broadcast %cst : f32 to vector<8x4096xf32>
    %3 = arith.maximumf %0, %2 : vector<8x4096xf32>
    %4 = arith.mulf %0, %1 : vector<8x4096xf32>
    %5 = arith.subf %3, %4 : vector<8x4096xf32>
    %6 = math.absf %0 : vector<8x4096xf32>
    %cst_3 = arith.constant 0.000000e+00 : f32
    %7 = vector.broadcast %cst_3 : f32 to vector<8x4096xf32>
    %8 = arith.subf %7, %6 : vector<8x4096xf32>
    %9 = math.exp %8 : vector<8x4096xf32>
    %10 = math.log1p %9 : vector<8x4096xf32>
    %11 = arith.addf %5, %10 : vector<8x4096xf32>
    %c0_i32 = arith.constant 0 : i32
    %12 = arith.cmpi eq, %arg1, %c0_i32 : i32
    %13 = arith.extui %12 : i1 to i32
    %c0_i32_4 = arith.constant 0 : i32
    %14 = arith.cmpi ne, %13, %c0_i32_4 : i32
    scf.if %14 {
      %cst_12 = arith.constant 0.000000e+00 : f32
      %23 = vector.broadcast %cst_12 : f32 to vector<8x1xf32>
      %c0_13 = arith.constant 0 : index
      %c0_14 = arith.constant 0 : index
      %24 = vector.load %arg4[%c0_13, %c0_14] : memref<8x1xf32, #tpu.memory_space<vmem>>, vector<8x1xf32>
      tpu.vector_store %arg4[%c0_13, %c0_14], %23 {strides = array<i32>} : memref<8x1xf32, #tpu.memory_space<vmem>>, vector<8x1xf32>,
    } else {
    }
    %c0_5 = arith.constant 0 : index
    %c0_6 = arith.constant 0 : index
    %15 = vector.load %arg4[%c0_5, %c0_6] : memref<8x1xf32, #tpu.memory_space<vmem>>, vector<8x1xf32>
    %cst_7 = arith.constant dense<0.000000e+00> : vector<8xf32>
    %16 = vector.multi_reduction <add>, %11, %cst_7 [1] : vector<8x4096xf32> to vector<8xf32>
    %17 = vector.shape_cast %16 : vector<8xf32> to vector<8x1xf32>
    %18 = arith.addf %15, %17 : vector<8x1xf32>
    %c0_8 = arith.constant 0 : index
    %c0_9 = arith.constant 0 : index
    %19 = vector.load %arg4[%c0_8, %c0_9] : memref<8x1xf32, #tpu.memory_space<vmem>>, vector<8x1xf32>
    tpu.vector_store %arg4[%c0_8, %c0_9], %18 {strides = array<i32>} : memref<8x1xf32, #tpu.memory_space<vmem>>, vector<8x1xf32>,
    %c0_i32_10 = arith.constant 0 : i32
    %20 = arith.cmpi eq, %arg1, %c0_i32_10 : i32
    %21 = arith.extui %20 : i1 to i32
    %c0_i32_11 = arith.constant 0 : i32
    %22 = arith.cmpi ne, %21, %c0_i32_11 : i32
    scf.if %22 {
      %c0_12 = arith.constant 0 : index
      %c0_13 = arith.constant 0 : index
      %23 = vector.load %arg4[%c0_12, %c0_13] : memref<8x1xf32, #tpu.memory_space<vmem>>, vector<8x1xf32>
      %cst_14 = arith.constant 2.44140625E-4 : f32
      %24 = vector.broadcast %cst_14 : f32 to vector<8x1xf32>
      %25 = arith.mulf %23, %24 : vector<8x1xf32>
      %c0_15 = arith.constant 0 : index
      %c0_16 = arith.constant 0 : index
      %26 = vector.load %arg4[%c0_15, %c0_16] : memref<8x1xf32, #tpu.memory_space<vmem>>, vector<8x1xf32>
      tpu.vector_store %arg4[%c0_15, %c0_16], %25 {strides = array<i32>} : memref<8x1xf32, #tpu.memory_space<vmem>>, vector<8x1xf32>,
    } else {
    }
    return
  }
  func.func @transform_0(%arg0: i32, %arg1: i32) -> (i32, i32) {
    %c0_i32 = arith.constant 0 : i32
    return %arg0, %arg1 : i32, i32
  }
  func.func @transform_1(%arg0: i32, %arg1: i32) -> (i32, i32) {
    %c0_i32 = arith.constant 0 : i32
    return %arg0, %arg1 : i32, i32
  }
  func.func @transform_2(%arg0: i32, %arg1: i32) -> (i32, i32) {
    %c0_i32 = arith.constant 0 : i32
    %c0_i32_0 = arith.constant 0 : i32
    return %arg0, %c0_i32 : i32, i32
  }
}

</mosaic_0001>

<bundles_post_ra>
// kernel: mask_loss.1
= control target key start
LH: loop header
LB: loop body
LE: loop exit
PB: predicated region body
PF: predicated region fallthrough
CT: control target
= control target key end

     0   :  { %vm623_vm0 = vcmask 7168   ;;  %v802_v23 = vmov 0.0   ;;  %s1811_s0 = inlined_call_operand.vmem [shape: f32[8,4096], index: 0, kind: input, shape index: {}]   ;;  %s1812_s2 = inlined_call_operand.vmem [shape: f32[8,1], index: 2, kind: output, shape index: {}]   ;;  %s1813_s1 = inlined_call_operand.vmem [shape: f32[8,4096], index: 1, kind: input, shape index: {}]  }
   0x1   :  { %v821_v0 = vld [vmem:[%s1811_s0] sm:$0xff]  ;;  %v826_v1 = vld [vmem:[%s1811_s0 + $0x8] sm:$0xff]  ;;  %v831_v2 = vld [vmem:[%s1811_s0 + $0x10] sm:$0xff]  ;;  %624 = vst.msk [vmem:[%s1812_s2] sm:$0xff] %vm623_vm0, %v802_v23 }
   0x2   :  { %1832 = vst [vmem:[#allocation2_spill] sm:$0xff] %v821_v0  ;;  %v836_v3 = vld [vmem:[%s1811_s0 + $0x18] sm:$0xff]  ;;  %v841_v4 = vld [vmem:[%s1811_s0 + $0x20] sm:$0xff]  ;;  %v846_v5 = vld [vmem:[%s1811_s0 + $0x28] sm:$0xff]  ;;  %v75_v10 = vmax.f32 %v821_v0, 0.0  ;;  %v76_v11 = vmax.f32 %v826_v1, 0.0 }
   0x3   :  { %1833 = vst [vmem:[#allocation3_spill] sm:$0xff] %v841_v4  ;;  %v851_v6 = vld [vmem:[%s1811_s0 + $0x30] sm:$0xff]  ;;  %v856_v7 = vld [vmem:[%s1811_s0 + $0x38] sm:$0xff]  ;;  %v861_v8 = vld [vmem:[%s1811_s0 + $0x40] sm:$0xff]  ;;  %v77_v15 = vmax.f32 %v831_v2, 0.0  ;;  %v78_v16 = vmax.f32 %v836_v3, 0.0 }
   0x4   :  { %v866_v9 = vld [vmem:[%s1811_s0 + $0x48] sm:$0xff]  ;;  %v873_v12 = vld [vmem:[%s1811_s0 + $0x50] sm:$0xff]  ;;  %v878_v13 = vld [vmem:[%s1811_s0 + $0x58] sm:$0xff] }
   0x5   :  { %v883_v14 = vld [vmem:[%s1811_s0 + $0x60] sm:$0xff]  ;;  %v890_v17 = vld [vmem:[%s1811_s0 + $0x68] sm:$0xff]  ;;  %v895_v18 = vld [vmem:[%s1811_s0 + $0x70] sm:$0xff] }
   0x6   :  { %v900_v19 = vld [vmem:[%s1811_s0 + $0x78] sm:$0xff]  ;;  %v912_v24 = vld [vmem:[%s1811_s0 + $0x80] sm:$0xff]  ;;  %v917_v25 = vld [vmem:[%s1811_s0 + $0x88] sm:$0xff] }
   0x7   :  { %v922_v26 = vld [vmem:[%s1811_s0 + $0x90] sm:$0xff]  ;;  %v930_v30 = vld [vmem:[%s1811_s0 + $0x98] sm:$0xff]  ;;  %v935_v31 = vld [vmem:[%s1811_s0 + $0xa0] sm:$0xff] }
   0x8   :  { %1834 = vst [vmem:[#allocation4_spill] sm:$0xff] %v922_v26  ;;  %v940_v32 = vld [vmem:[%s1811_s0 + $0xa8] sm:$0xff]  ;;  %v948_v36 = vld [vmem:[%s1811_s0 + $0xb0] sm:$0xff]  ;;  %v953_v37 = vld [vmem:[%s1811_s0 + $0xb8] sm:$0xff] }
   0x9   :  { %1835 = vst [vmem:[#allocation5_spill] sm:$0xff] %v940_v32  ;;  %v958_v38 = vld [vmem:[%s1811_s0 + $0xc0] sm:$0xff]  ;;  %v969_v43 = vld [vmem:[%s1811_s0 + $0xc8] sm:$0xff]  ;;  %v974_v44 = vld [vmem:[%s1811_s0 + $0xd0] sm:$0xff] }
   0xa   :  { %v43_v39 = vld [vmem:[%s1813_s1] sm:$0xff]  ;;  %v979_v45 = vld [vmem:[%s1811_s0 + $0xd8] sm:$0xff]  ;;  %v44_v46 = vld [vmem:[%s1813_s1 + $0x8] sm:$0xff] }
   0xb   :  { %v990_v50 = vld [vmem:[%s1811_s0 + $0xe0] sm:$0xff]  ;;  %v995_v51 = vld [vmem:[%s1811_s0 + $0xe8] sm:$0xff]  ;;  %v45_v52 = vld [vmem:[%s1813_s1 + $0x10] sm:$0xff]  ;;  %v107_v62 = vmul.f32 %v43_v39, %v821_v0  ;;  %v108_v39 = vmul.f32 %v44_v46, %v826_v1 }
   0xc   :  { %1836 = vst [vmem:[#allocation6_spill] sm:$0xff] %v995_v51  ;;  %v1006_v56 = vld [vmem:[%s1811_s0 + $0xf0] sm:$0xff]  ;;  %v1011_v57 = vld [vmem:[%s1811_s0 + $0xf8] sm:$0xff]  ;;  %v47_v63 = vld [vmem:[%s1813_s1 + $0x20] sm:$0xff]  ;;  %v109_v46 = vmul.f32 %v45_v52, %v831_v2 }
   0xd   :  { %1837 = vst [vmem:[#allocation7_spill] sm:$0xff] %v1006_v56  ;;  %1838 = vst [vmem:[#allocation8_spill] sm:$0xff] %v1011_v57  ;;  %v46_v58 = vld [vmem:[%s1813_s1 + $0x18] sm:$0xff]  ;;  %v48_v23 = vld [vmem:[%s1813_s1 + $0x28] sm:$0xff]  ;;  %v111_v35 = vmul.f32 %v47_v63, %v841_v4  ;;  %v1072_v61 = vsub.f32 %v75_v10, %v107_v62  ;;  %v1088_v10 = vsub.f32 %v76_v11, %v108_v39 }
   0xe   :  { %v49_v55 = vld [vmem:[%s1813_s1 + $0x30] sm:$0xff]  ;;  %v50_v54 = vld [vmem:[%s1813_s1 + $0x38] sm:$0xff]  ;;  %v51_v53 = vld [vmem:[%s1813_s1 + $0x40] sm:$0xff]  ;;  %v110_v60 = vmul.f32 %v46_v58, %v836_v3  ;;  %v112_v59 = vmul.f32 %v48_v23, %v846_v5  ;;  %v1104_v11 = vsub.f32 %v77_v15, %v109_v46 }
   0xf   :  { %v52_v49 = vld [vmem:[%s1813_s1 + $0x48] sm:$0xff]  ;;  %v53_v48 = vld [vmem:[%s1813_s1 + $0x50] sm:$0xff]  ;;  %v54_v47 = vld [vmem:[%s1813_s1 + $0x58] sm:$0xff]  ;;  %v113_v58 = vmul.f32 %v49_v55, %v851_v6  ;;  %1839 = vst [vmem:[#allocation9_spill] sm:$0xff] %v1072_v61  ;;  %v114_v23 = vmul.f32 %v50_v54, %v856_v7  ;;  %v115_v55 = vmul.f32 %v51_v53, %v861_v8 }
  0x10   :  { %v55_v42 = vld [vmem:[%s1813_s1 + $0x60] sm:$0xff]  ;;  %v56_v52 = vld [vmem:[%s1813_s1 + $0x68] sm:$0xff]  ;;  %v57_v41 = vld [vmem:[%s1813_s1 + $0x70] sm:$0xff]  ;;  %v116_v29 = vmul.f32 %v52_v49, %v866_v9  ;;  %1840 = vst [vmem:[#allocation10_spill] sm:$0xff] %v1088_v10  ;;  %v117_v53 = vmul.f32 %v53_v48, %v873_v12  ;;  %v118_v49 = vmul.f32 %v54_v47, %v878_v13  ;;  %v1120_v15 = vsub.f32 %v78_v16, %v110_v60 }
  0x11   :  { %v58_v40 = vld [vmem:[%s1813_s1 + $0x78] sm:$0xff]  ;;  %v59_v34 = vld [vmem:[%s1813_s1 + $0x80] sm:$0xff]  ;;  %v60_v33 = vld [vmem:[%s1813_s1 + $0x88] sm:$0xff]  ;;  %v119_v27 = vmul.f32 %v55_v42, %v883_v14  ;;  %1841 = vst [vmem:[#allocation11_spill] sm:$0xff] %v1104_v11  ;;  %v120_v47 = vmul.f32 %v56_v52, %v890_v17  ;;  %v121_v42 = vmul.f32 %v57_v41, %v895_v18  ;;  %v1843_v16 = vmax.f32 %v841_v4, 0.0 }
  0x12   :  { %v61_v63 = vld [vmem:[%s1813_s1 + $0x90] sm:$0xff]  ;;  %v62_v62 = vld [vmem:[%s1813_s1 + $0x98] sm:$0xff]  ;;  %v63_v28 = vld [vmem:[%s1813_s1 + $0xa0] sm:$0xff]  ;;  %v122_v21 = vmul.f32 %v58_v40, %v900_v19  ;;  %1842 = vst [vmem:[#allocation12_spill] sm:$0xff] %v1120_v15  ;;  %v123_v41 = vmul.f32 %v59_v34, %v912_v24  ;;  %v124_v40 = vmul.f32 %v60_v33, %v917_v25  ;;  %v1846_v4 = vmax.f32 %v851_v6, 0.0 }
  0x13   :  { %v64_v54 = vld [vmem:[%s1813_s1 + $0xa8] sm:$0xff]  ;;  %v65_v39 = vld [vmem:[%s1813_s1 + $0xb0] sm:$0xff]  ;;  %v66_v22 = vld [vmem:[%s1813_s1 + $0xb8] sm:$0xff]  ;;  %v125_v11 = vmul.f32 %v61_v63, %v922_v26  ;;  %v1136_v60 = vsub.f32 %v1843_v16, %v111_v35  ;;  %v126_v33 = vmul.f32 %v62_v62, %v930_v30  ;;  %v127_v63 = vmul.f32 %v63_v28, %v935_v31 }
  0x14   :  { %v67_v48 = vld [vmem:[%s1813_s1 + $0xc0] sm:$0xff]  ;;  %v68_v46 = vld [vmem:[%s1813_s1 + $0xc8] sm:$0xff]  ;;  %v69_v20 = vld [vmem:[%s1813_s1 + $0xd0] sm:$0xff]  ;;  %v128_v61 = vmul.f32 %v64_v54, %v940_v32  ;;  %v1845_v35 = vmax.f32 %v846_v5, 0.0  ;;  %v130_v57 = vmul.f32 %v66_v22, %v953_v37  ;;  %v1159_v26 = vsub.f32 %v1846_v4, %v113_v58 }
  0x15   :  { %v70_v52 = vld [vmem:[%s1813_s1 + $0xd8] sm:$0xff]  ;;  %1844 = vst [vmem:[#allocation13_spill] sm:$0xff] %v1136_v60  ;;  %v71_v15 = vld [vmem:[%s1813_s1 + $0xe0] sm:$0xff]  ;;  %v72_v10 = vld [vmem:[%s1813_s1 + $0xe8] sm:$0xff]  ;;  %v129_v60 = vmul.f32 %v65_v39, %v948_v36  ;;  %v131_v0 = vmul.f32 %v67_v48, %v958_v38  ;;  %v132_v62 = vmul.f32 %v68_v46, %v969_v43  ;;  %v133_v28 = vmul.f32 %v69_v20, %v974_v44 }
  0x16   :  { %v73_v34 = vld [vmem:[%s1813_s1 + $0xf0] sm:$0xff]  ;;  %v1152_v16 = vsub.f32 %v1845_v35, %v112_v59  ;;  %v134_v54 = vmul.f32 %v70_v52, %v979_v45  ;;  %v1847_v32 = vmax.f32 %v856_v7, 0.0  ;;  %v135_v39 = vmul.f32 %v71_v15, %v990_v50 }
  0x17   :  { %v1170_v22 = vmul.f32 %v72_v10, %v995_v51  ;;  %v1173_v48 = vmul.f32 %v73_v34, %v1006_v56  ;;  %v1850_v4 = vmax.f32 %v861_v8, 0.0  ;;  %v1851_v20 = vmax.f32 %v866_v9, 0.0 }
  0x18   :  { %v1166_v59 = vsub.f32 %v1847_v32, %v114_v23  ;;  %v1852_v52 = vmax.f32 %v873_v12, 0.0  ;;  %v1853_v23 = vmax.f32 %v878_v13, 0.0  ;;  %v1855_v10 = vmax.f32 %v883_v14, 0.0 }
  0x19   :  { %1848 = vst [vmem:[#allocation14_spill] sm:$0xff] %v1170_v22  ;;  %1849 = vst [vmem:[#allocation15_spill] sm:$0xff] %v1173_v48  ;;  %v1177_v58 = vsub.f32 %v1850_v4, %v115_v55  ;;  %v1181_v46 = vsub.f32 %v1851_v20, %v116_v29  ;;  %v1857_v35 = vmax.f32 %v890_v17, 0.0  ;;  %v1859_v4 = vmax.f32 %v895_v18, 0.0 }
  0x1a   :  { %v1185_v32 = vsub.f32 %v1852_v52, %v117_v53  ;;  %v1189_v15 = vsub.f32 %v1853_v23, %v118_v49  ;;  %v1193_v34 = vsub.f32 %v1855_v10, %v119_v27  ;;  %v1861_v20 = vmax.f32 %v900_v19, 0.0 }
  0x1b   :  { %v1197_v55 = vsub.f32 %v1857_v35, %v120_v47  ;;  %v1201_v29 = vsub.f32 %v1859_v4, %v121_v42  ;;  %v1863_v52 = vmax.f32 %v912_v24, 0.0  ;;  %v1865_v23 = vmax.f32 %v917_v25, 0.0  ;;  %v1867_v42 = vld [vmem:[#allocation4_spill] sm:$0xff] }
  0x1c   :  { %1854 = vst [vmem:[#allocation16_spill] sm:$0xff] %v1189_v15  ;;  %1856 = vst [vmem:[#allocation17_spill] sm:$0xff] %v1193_v34  ;;  %v1205_v53 = vsub.f32 %v1861_v20, %v122_v21  ;;  %v172_v10 = vand.u32 2147483647, %v826_v1  ;;  %v173_v47 = vand.u32 2147483647, %v831_v2 }
  0x1d   :  { %1858 = vst [vmem:[#allocation18_spill] sm:$0xff] %v1197_v55  ;;  %1860 = vst [vmem:[#allocation19_spill] sm:$0xff] %v1201_v29  ;;  %v1209_v49 = vsub.f32 %v1863_v52, %v123_v41  ;;  %v1213_v27 = vsub.f32 %v1865_v23, %v124_v40  ;;  %v174_v35 = vand.u32 2147483647, %v836_v3  ;;  %v1868_v4 = vmax.f32 %v1867_v42, 0.0  ;;  %v1870_v21 = vld [vmem:[#allocation3_spill] sm:$0xff] }
  0x1e   :  { %1862 = vst [vmem:[#allocation20_spill] sm:$0xff] %v1205_v53  ;;  %v175_v20 = vand.u32 2147483647, %v1870_v21  ;;  %v176_v22 = vand.u32 2147483647, %v846_v5  ;;  %v1871_v52 = vmax.f32 %v930_v30, 0.0 }
  0x1f   :  { %1864 = vst [vmem:[#allocation21_spill] sm:$0xff] %v1209_v49  ;;  %1866 = vst [vmem:[#allocation22_spill] sm:$0xff] %v1213_v27  ;;  %v1220_v48 = vsub.f32 %v1868_v4, %v125_v11  ;;  %v177_v41 = vand.u32 2147483647, %v851_v6  ;;  %v178_v1 = vand.u32 2147483647, %v856_v7 }
  0x20   :  { %v1227_v40 = vsub.f32 %v1871_v52, %v126_v33  ;;  %v179_v2 = vand.u32 2147483647, %v861_v8  ;;  %v180_v3 = vand.u32 2147483647, %v866_v9  ;;  %v1873_v23 = vmax.f32 %v935_v31, 0.0  ;;  %v1875_v21 = vld [vmem:[#allocation5_spill] sm:$0xff] }
  0x21   :  { %1869 = vst [vmem:[#allocation4_spill] sm:$0xff] %v1220_v48  ;;  %v181_v4 = vand.u32 2147483647, %v873_v12  ;;  %v182_v5 = vand.u32 2147483647, %v878_v13  ;;  %v1876_v48 = vmax.f32 %v1875_v21, 0.0 }
  0x22   :  { %1872 = vst [vmem:[#allocation3_spill] sm:$0xff] %v1227_v40  ;;  %v1234_v11 = vsub.f32 %v1873_v23, %v127_v63  ;;  %v183_v6 = vand.u32 2147483647, %v883_v14  ;;  %v184_v7 = vand.u32 2147483647, %v890_v17  ;;  %v1878_v52 = vld [vmem:[#allocation2_spill] sm:$0xff] }
  0x23   :  { %v1241_v33 = vsub.f32 %v1876_v48, %v128_v61  ;;  %v185_v8 = vand.u32 2147483647, %v895_v18  ;;  %v1879_v9 = vand.u32 2147483647, %v1878_v52  ;;  %v1880_v63 = vmax.f32 %v948_v36, 0.0  ;;  %v1934_v29 = vld [vmem:[#allocation11_spill] sm:$0xff] }
  0x24   :  { %1874 = vst [vmem:[#allocation23_spill] sm:$0xff] %v1234_v11  ;;  %v186_v12 = vand.u32 2147483647, %v900_v19  ;;  %v187_v13 = vand.u32 2147483647, %v912_v24  ;;  %v204_v14 = vsub.f32 0.0, %v172_v10 }
  0x25   :  { %1877 = vst [vmem:[#allocation5_spill] sm:$0xff] %v1241_v33  ;;  %v203_v40 = vsub.f32 0.0, %v1879_v9  ;;  %v1249_v23 = vsub.f32 %v1880_v63, %v129_v60  ;;  %v1882_v11 = vmax.f32 %v953_v37, 0.0  ;;  %v188_v17 = vand.u32 2147483647, %v917_v25 }
  0x26   :  { %v189_v18 = vand.u32 2147483647, %v1867_v42  ;;  %v205_v48 = vsub.f32 0.0, %v173_v47  ;;  %v1884_v52 = vmax.f32 %v958_v38, 0.0  ;;  %v190_v60 = vand.u32 2147483647, %v930_v30 }
  0x27   :  { %1881 = vst [vmem:[#allocation2_spill] sm:$0xff] %v1249_v23  ;;  %v1255_v61 = vsub.f32 %v1882_v11, %v130_v57  ;;  %v191_v19 = vand.u32 2147483647, %v935_v31  ;;  %v206_v63 = vsub.f32 0.0, %v174_v35  ;;  %v1886_v24 = vmax.f32 %v969_v43, 0.0 }
  0x28   :  { %v1261_v9 = vsub.f32 %v1884_v52, %v131_v0  ;;  %v192_v57 = vand.u32 2147483647, %v1875_v21  ;;  %v207_v11 = vsub.f32 0.0, %v175_v20  ;;  %v235_v25 = vmul.f32 1.442695, %v203_v40 }
  0x29   :  { %1883 = vst [vmem:[#allocation24_spill] sm:$0xff] %v1255_v61  ;;  %v1267_v10 = vsub.f32 %v1886_v24, %v132_v62  ;;  %v1888_v42 = vmax.f32 %v974_v44, 0.0  ;;  %v193_v0 = vand.u32 2147483647, %v948_v36  ;;  %v208_v52 = vsub.f32 0.0, %v176_v22 }
  0x2a   :  { %1885 = vst [vmem:[#allocation25_spill] sm:$0xff] %v1261_v9  ;;  %v237_v9 = vmul.f32 1.442695, %v204_v14  ;;  %v1890_v30 = vmax.f32 %v979_v45, 0.0  ;;  %v194_v35 = vand.u32 2147483647, %v953_v37  ;;  %673 = vpow2.f32 %v235_v25 }
  0x2b   :  { %1887 = vst [vmem:[#allocation26_spill] sm:$0xff] %v1267_v10  ;;  %v1272_v47 = vsub.f32 %v1888_v42, %v133_v28  ;;  %v209_v62 = vsub.f32 0.0, %v177_v41  ;;  %v239_v24 = vmul.f32 1.442695, %v205_v48  ;;  %v1892_v21 = vmax.f32 %v990_v50, 0.0 }
  0x2c   :  { %v1277_v31 = vsub.f32 %v1890_v30, %v134_v54  ;;  %v195_v40 = vand.u32 2147483647, %v958_v38  ;;  %v210_v28 = vsub.f32 0.0, %v178_v1  ;;  %v241_v42 = vmul.f32 1.442695, %v206_v63 }
  0x2d   :  { %1889 = vst [vmem:[#allocation27_spill] sm:$0xff] %v1272_v47  ;;  %v1282_v20 = vsub.f32 %v1892_v21, %v135_v39  ;;  %v196_v36 = vand.u32 2147483647, %v969_v43  ;;  %v211_v22 = vsub.f32 0.0, %v179_v2  ;;  %v243_v14 = vmul.f32 1.442695, %v207_v11 }
  0x2e   :  { %1891 = vst [vmem:[#allocation28_spill] sm:$0xff] %v1277_v31  ;;  %v197_v54 = vand.u32 2147483647, %v974_v44  ;;  %v212_v30 = vsub.f32 0.0, %v180_v3  ;;  %675 = vpow2.f32 %v237_v9  ;;  %v245_v37 = vmul.f32 1.442695, %v208_v52 }
  0x2f   :  { %1893 = vst [vmem:[#allocation29_spill] sm:$0xff] %v1282_v20  ;;  %v198_v41 = vand.u32 2147483647, %v979_v45  ;;  %v213_v48 = vsub.f32 0.0, %v181_v4  ;;  %677 = vpow2.f32 %v239_v24  ;;  %v247_v39 = vmul.f32 1.442695, %v209_v62 }
  0x30   :  { %v199_v21 = vand.u32 2147483647, %v990_v50  ;;  %v214_v38 = vsub.f32 0.0, %v182_v5  ;;  %679 = vpow2.f32 %v241_v42  ;;  %v249_v1 = vmul.f32 1.442695, %v210_v28  ;;  %v1894_v11 = vld [vmem:[#allocation8_spill] sm:$0xff] }
  0x31   :  { %v200_v43 = vand.u32 2147483647, %v995_v51  ;;  %v215_v2 = vsub.f32 0.0, %v183_v6  ;;  %681 = vpow2.f32 %v243_v14  ;;  %v251_v63 = vmul.f32 1.442695, %v211_v22 }
  0x32   :  { %v201_v44 = vand.u32 2147483647, %v1006_v56  ;;  %v216_v3 = vsub.f32 0.0, %v184_v7  ;;  %683 = vpow2.f32 %v245_v37  ;;  %v253_v9 = vmul.f32 1.442695, %v212_v30 }
  0x33   :  { %v202_v45 = vand.u32 2147483647, %v1894_v11  ;;  %v217_v4 = vsub.f32 0.0, %v185_v8  ;;  %685 = vpow2.f32 %v247_v39  ;;  %v255_v25 = vmul.f32 1.442695, %v213_v48 }
  0x34   :  { %v218_v52 = vsub.f32 0.0, %v186_v12  ;;  %v219_v50 = vsub.f32 0.0, %v187_v13  ;;  %687 = vpow2.f32 %v249_v1  ;;  %v257_v5 = vmul.f32 1.442695, %v214_v38  ;;  %v1292_v7 = vpop.eup %673 }
  0x35   :  { %v220_v62 = vsub.f32 0.0, %v188_v17  ;;  %v221_v24 = vsub.f32 0.0, %v189_v18  ;;  %689 = vpow2.f32 %v251_v63  ;;  %v259_v6 = vmul.f32 1.442695, %v215_v2 }
  0x36   :  { %v222_v28 = vsub.f32 0.0, %v190_v60  ;;  %v223_v42 = vsub.f32 0.0, %v191_v19  ;;  %691 = vpow2.f32 %v253_v9  ;;  %v261_v22 = vmul.f32 1.442695, %v216_v3 }
  0x37   :  { %v224_v14 = vsub.f32 0.0, %v192_v57  ;;  %v225_v30 = vsub.f32 0.0, %v193_v0  ;;  %693 = vpow2.f32 %v255_v25  ;;  %v263_v8 = vmul.f32 1.442695, %v217_v4 }
  0x38   :  { %v1294_v37 = vpop.eup %675  ;;  %v226_v12 = vsub.f32 0.0, %v194_v35  ;;  %v227_v13 = vsub.f32 0.0, %v195_v40  ;;  %695 = vpow2.f32 %v257_v5  ;;  %v265_v48 = vmul.f32 1.442695, %v218_v52 }
  0x39   :  { %v1296_v17 = vpop.eup %677  ;;  %v228_v18 = vsub.f32 0.0, %v196_v36  ;;  %v229_v39 = vsub.f32 0.0, %v197_v54  ;;  %697 = vpow2.f32 %v259_v6  ;;  %v267_v60 = vmul.f32 1.442695, %v219_v50 }
  0x3a   :  { %v1298_v19 = vpop.eup %679  ;;  %v230_v38 = vsub.f32 0.0, %v198_v41  ;;  %v231_v1 = vsub.f32 0.0, %v199_v21  ;;  %699 = vpow2.f32 %v261_v22  ;;  %v269_v57 = vmul.f32 1.442695, %v220_v62 }
  0x3b   :  { %v1300_v0 = vpop.eup %681  ;;  %v232_v2 = vsub.f32 0.0, %v200_v43  ;;  %v233_v63 = vsub.f32 0.0, %v201_v44  ;;  %701 = vpow2.f32 %v263_v8  ;;  %v271_v35 = vmul.f32 1.442695, %v221_v24 }
  0x3c   :  { %v1302_v40 = vpop.eup %683  ;;  %v234_v3 = vsub.f32 0.0, %v202_v45  ;;  %703 = vpow2.f32 %v265_v48  ;;  %v273_v36 = vmul.f32 1.442695, %v222_v28  ;;  %v275_v54 = vmul.f32 1.442695, %v223_v42 }
  0x3d   :  { %v1304_v9 = vpop.eup %685  ;;  %705 = vpow2.f32 %v267_v60  ;;  %v277_v4 = vmul.f32 1.442695, %v224_v14  ;;  %v279_v41 = vmul.f32 1.442695, %v225_v30  ;;  %v302_v21 = vmul.f32 -0.5, %v1292_v7 }
  0x3e   :  { %v1307_v25 = vpop.eup %687  ;;  %707 = vpow2.f32 %v269_v57  ;;  %v281_v43 = vmul.f32 1.442695, %v226_v12  ;;  %v283_v44 = vmul.f32 1.442695, %v227_v13  ;;  %v311_v52 = vmul.f32 -0.5, %v1294_v37 }
  0x3f   :  { %v1310_v50 = vpop.eup %689  ;;  %709 = vpow2.f32 %v271_v35  ;;  %v285_v45 = vmul.f32 1.442695, %v228_v18  ;;  %v287_v5 = vmul.f32 1.442695, %v229_v39  ;;  %v289_v62 = vmul.f32 1.442695, %v230_v38 }
  0x40   :  { %v1312_v24 = vpop.eup %691  ;;  %711 = vpow2.f32 %v273_v36  ;;  %v291_v6 = vmul.f32 1.442695, %v231_v1  ;;  %v1314_v28 = vmul.f32 1.442695, %v232_v2  ;;  %v320_v42 = vmul.f32 -0.5, %v1296_v17 }
  0x41   :  { %v1317_v22 = vpop.eup %693  ;;  %713 = vpow2.f32 %v275_v54  ;;  %v1319_v14 = vmul.f32 1.442695, %v233_v63  ;;  %v1321_v30 = vmul.f32 1.442695, %v234_v3  ;;  %v303_v8 = vadd.f32 1.0, %v302_v21 }
  0x42   :  { %v1323_v12 = vpop.eup %695  ;;  %715 = vpow2.f32 %v277_v4  ;;  %v299_v13 = vadd.f32 1.0, %v1292_v7  ;;  %v312_v48 = vadd.f32 1.0, %v311_v52  ;;  %v329_v18 = vmul.f32 -0.5, %v1298_v19 }
  0x43   :  { %v1327_v39 = vpop.eup %697  ;;  %717 = vpow2.f32 %v279_v41  ;;  %v305_v60 = vand.u32 2147483647, %v1292_v7  ;;  %v308_v38 = vadd.f32 1.0, %v1294_v37  ;;  %v338_v1 = vmul.f32 -0.5, %v1300_v0 }
  0x44   :  { %v1332_v57 = vpop.eup %699  ;;  %719 = vpow2.f32 %v281_v43  ;;  %v314_v2 = vand.u32 2147483647, %v1294_v37  ;;  %v317_v63 = vadd.f32 1.0, %v1296_v17  ;;  %v321_v35 = vadd.f32 1.0, %v320_v42 }
  0x45   :  { %v1336_v3 = vpop.eup %701  ;;  %721 = vpow2.f32 %v283_v44  ;;  %v1339_v36 = vmul.f32 %v1292_v7, %v303_v8  ;;  %v323_v54 = vand.u32 2147483647, %v1296_v17  ;;  %v347_v4 = vmul.f32 -0.5, %v1302_v40 }
  0x46   :  { %v1343_v41 = vpop.eup %703  ;;  %723 = vpow2.f32 %v285_v45  ;;  %v1346_v21 = vmul.f32 %v1294_v37, %v312_v48  ;;  %v326_v43 = vadd.f32 1.0, %v1298_v19  ;;  %v330_v52 = vadd.f32 1.0, %v329_v18 }
  0x47   :  { %v1349_v42 = vpop.eup %705  ;;  %725 = vpow2.f32 %v287_v5  ;;  %v332_v44 = vand.u32 2147483647, %v1298_v19  ;;  %v339_v7 = vadd.f32 1.0, %v338_v1  ;;  %v356_v8 = vmul.f32 -0.5, %v1304_v9 }
  0x48   :  { %v1353_v11 = vpop.eup %707  ;;  %727 = vlog2.f32 %v299_v13  ;;  %v1356_v20 = vmul.f32 %v1296_v17, %v321_v35  ;;  %v335_v37 = vadd.f32 1.0, %v1300_v0  ;;  %v344_v5 = vadd.f32 1.0, %v1302_v40 }
  0x49   :  { %v1360_v48 = vpop.eup %709  ;;  %729 = vlog2.f32 %v308_v38  ;;  %v348_v18 = vadd.f32 1.0, %v347_v4  ;;  %v365_v1 = vmul.f32 -0.5, %v1307_v25  ;;  %v1367_v13 = vmul.f32 %v1298_v19, %v330_v52 }
  0x4a   :  { %v1364_v56 = vpop.eup %711  ;;  %731 = vpow2.f32 %v289_v62  ;;  %v374_v35 = vmul.f32 -0.5, %v1310_v50  ;;  %v1374_v38 = vmul.f32 %v1300_v0, %v339_v7  ;;  %v353_v4 = vadd.f32 1.0, %v1304_v9 }
  0x4b   :  { %v1371_v31 = vpop.eup %713  ;;  %733 = vlog2.f32 %v317_v63  ;;  %v357_v45 = vadd.f32 1.0, %v356_v8  ;;  %v362_v19 = vadd.f32 1.0, %v1307_v25  ;;  %v383_v52 = vmul.f32 -0.5, %v1312_v24 }
  0x4c   :  { %v1377_v51 = vpop.eup %715  ;;  %735 = vpow2.f32 %v291_v6  ;;  %v1385_v63 = vmul.f32 %v1302_v40, %v348_v18  ;;  %v366_v7 = vadd.f32 1.0, %v365_v1  ;;  %v392_v47 = vmul.f32 -0.5, %v1317_v22 }
  0x4d   :  { %v1382_v17 = vpop.eup %717  ;;  %737 = vlog2.f32 %v326_v43  ;;  %v371_v8 = vadd.f32 1.0, %v1310_v50  ;;  %v375_v62 = vadd.f32 1.0, %v374_v35  ;;  %vm1395_vm1 = vcmp.lt.f32.partialorder %v305_v60, 0.0004427343 }
  0x4e   :  { %v1388_v10 = vpop.eup %719  ;;  %739 = vpow2.f32 %v1314_v28  ;;  %vm1399_vm2 = vcmp.lt.f32.partialorder %v314_v2, 0.0004427343  ;;  %v1404_v18 = vmul.f32 %v1304_v9, %v357_v45  ;;  %v401_v1 = vmul.f32 -0.5, %v1323_v12 }
  0x4f   :  { %v1393_v61 = vpop.eup %721  ;;  %741 = vlog2.f32 %v335_v37  ;;  %v380_v60 = vadd.f32 1.0, %v1312_v24  ;;  %v384_v35 = vadd.f32 1.0, %v383_v52  ;;  %v410_v2 = vmul.f32 -0.5, %v1327_v39  ;;  %v1928_v37 = vld [vmem:[#allocation9_spill] sm:$0xff] }
  0x50   :  { %1895 = vst [vmem:[#allocation30_spill] sm:$0xff] %v1393_v61  ;;  %v1408_v6 = vpop.eup %723  ;;  %743 = vpow2.f32 %v1319_v14  ;;  %vm1415_vm3 = vcmp.lt.f32.partialorder %v323_v54, 0.0004427343  ;;  %v1420_v45 = vmul.f32 %v1307_v25, %v366_v7  ;;  %v393_v28 = vadd.f32 1.0, %v392_v47 }
  0x51   :  { %1900 = vst [vmem:[#allocation31_spill] sm:$0xff] %v1408_v6  ;;  %v1413_v33 = vpop.eup %725  ;;  %745 = vlog2.f32 %v344_v5  ;;  %v419_v27 = vmul.f32 -0.5, %v1332_v57  ;;  %v1425_v14 = vmul.f32 %v1310_v50, %v375_v62  ;;  %v386_v52 = vand.u32 2147483647, %v1312_v24 }
  0x52   :  { %1901 = vst [vmem:[#allocation32_spill] sm:$0xff] %v1413_v33  ;;  %v728_v49 = vpop.eup %727  ;;  %747 = vpow2.f32 %v1321_v30  ;;  %v389_v54 = vadd.f32 1.0, %v1317_v22  ;;  %vm1429_vm4 = vcmp.lt.f32.partialorder %v332_v44, 0.0004427343  ;;  %v395_v47 = vand.u32 2147483647, %v1317_v22 }
  0x53   :  { %v730_v53 = vpop.eup %729  ;;  %749 = vlog2.f32 %v353_v4  ;;  %v398_v5 = vadd.f32 1.0, %v1323_v12  ;;  %v402_v7 = vadd.f32 1.0, %v401_v1  ;;  %v1438_v30 = vmul.f32 %v1312_v24, %v384_v35 }
  0x54   :  { %v1435_v33 = vpop.eup %731  ;;  %751 = vlog2.f32 %v362_v19  ;;  %v404_v62 = vand.u32 2147483647, %v1323_v12  ;;  %v411_v55 = vadd.f32 1.0, %v410_v2  ;;  %v1907_v44 = vand.u32 2147483647, %v1300_v0 }
  0x55   :  { %1906 = vst [vmem:[#allocation33_spill] sm:$0xff] %v1435_v33  ;;  %v734_v6 = vpop.eup %733  ;;  %v1448_v4 = vmul.f32 %v1317_v22, %v393_v28  ;;  %v407_v1 = vadd.f32 1.0, %v1327_v39  ;;  %v420_v33 = vadd.f32 1.0, %v419_v27  ;;  %v301_v35 = vmul.f32 0.6931472, %v728_v49 }
  0x56   :  { %vm1443_vm5 = vcmp.lt.f32.partialorder %v1907_v44, 0.0004427343  ;;  %v1452_v24 = vpop.eup %735  ;;  %v310_v61 = vmul.f32 0.6931472, %v730_v53  ;;  %753 = vlog2.f32 %v371_v8  ;;  %v416_v2 = vadd.f32 1.0, %v1332_v57 }
  0x57   :  { %1910 = vst [vmem:[#allocation34_spill] sm:$0xff] %v1452_v24  ;;  %v738_v0 = vpop.eup %737  ;;  %v1911_v44 = vand.u32 2147483647, %v1302_v40  ;;  %755 = vlog2.f32 %v380_v60  ;;  %v1462_v22 = vmul.f32 %v1323_v12, %v402_v7  ;;  %v422_v27 = vand.u32 2147483647, %v1332_v57 }
  0x58   :  { %v428_v28 = vmul.f32 -0.5, %v1336_v3  ;;  %v1466_v49 = vpop.eup %739  ;;  %v319_v53 = vmul.f32 0.6931472, %v734_v6  ;;  %757 = vlog2.f32 %v389_v54  ;;  %v1469_v8 = vmul.f32 %v1327_v39, %v411_v55 }
  0x59   :  { %vm1457_vm6 = vcmp.lt.f32.partialorder %v1911_v44, 0.0004427343  ;;  %1914 = vst [vmem:[#allocation35_spill] sm:$0xff] %v1466_v49  ;;  %v425_v40 = vadd.f32 1.0, %v1336_v3  ;;  %v742_v44 = vpop.eup %741  ;;  %v1915_v19 = vand.u32 2147483647, %v1304_v9  ;;  %759 = vlog2.f32 %v398_v5 }
  0x5a   :  { %v1479_v12 = vmul.f32 %v1332_v57, %v420_v33  ;;  %v431_v7 = vand.u32 2147483647, %v1336_v3  ;;  %v434_v6 = vadd.f32 1.0, %v1343_v41  ;;  %v1483_v54 = vpop.eup %743  ;;  %v307_v55 = vsel %vm1395_vm1, %v1339_v36, %v301_v35 }
  0x5b   :  { %vm1474_vm7 = vcmp.lt.f32.partialorder %v1915_v19, 0.0004427343  ;;  %1918 = vst [vmem:[#allocation36_spill] sm:$0xff] %v1483_v54  ;;  %v316_v9 = vsel %vm1399_vm2, %v1346_v21, %v310_v61  ;;  %v328_v19 = vmul.f32 0.6931472, %v738_v0  ;;  %v437_v57 = vmul.f32 -0.5, %v1343_v41  ;;  %v746_v49 = vpop.eup %745 }
  0x5c   :  { %v1919_v5 = vand.u32 2147483647, %v1307_v25  ;;  %761 = vlog2.f32 %v407_v1  ;;  %v429_v54 = vadd.f32 1.0, %v428_v28  ;;  %v440_v24 = vand.u32 2147483647, %v1343_v41  ;;  %v1500_v36 = vpop.eup %747 }
  0x5d   :  { %v443_v23 = vadd.f32 1.0, %v1349_v42  ;;  %1922 = vst [vmem:[#allocation37_spill] sm:$0xff] %v1500_v36  ;;  %v325_v61 = vsel %vm1415_vm3, %v1356_v20, %v319_v53  ;;  %v337_v25 = vmul.f32 0.6931472, %v742_v44  ;;  %763 = vlog2.f32 %v416_v2  ;;  %v750_v43 = vpop.eup %749  ;;  %v1929_v53 = vld [vmem:[#allocation10_spill] sm:$0xff] }
  0x5e   :  { %vm1493_vm8 = vcmp.lt.f32.partialorder %v1919_v5, 0.0004427343  ;;  %v446_v21 = vmul.f32 -0.5, %v1349_v42  ;;  %v1923_v35 = vand.u32 2147483647, %v1310_v50  ;;  %765 = vlog2.f32 %v425_v40  ;;  %v752_v44 = vpop.eup %751 }
  0x5f   :  { %vm1512_vm10 = vcmp.lt.f32.partialorder %v386_v52, 0.0004427343  ;;  %v452_v28 = vadd.f32 1.0, %v1353_v11  ;;  %v587_v20 = vadd.f32 %v307_v55, %v1928_v37  ;;  %v588_v2 = vadd.f32 %v316_v9, %v1929_v53 }
  0x60   :  { %vm1508_vm9 = vcmp.lt.f32.partialorder %v1923_v35, 0.0004427343  ;;  %v334_v50 = vsel %vm1429_vm4, %v1367_v13, %v328_v19  ;;  %v346_v5 = vmul.f32 0.6931472, %v746_v49  ;;  %vm1522_vm11 = vcmp.lt.f32.partialorder %v395_v47, 0.0004427343  ;;  %v754_v49 = vpop.eup %753 }
  0x61   :  { %v438_v52 = vadd.f32 1.0, %v437_v57  ;;  %v455_v36 = vmul.f32 -0.5, %v1353_v11  ;;  %vm1527_vm12 = vcmp.lt.f32.partialorder %v404_v62, 0.0004427343  ;;  %v1532_v55 = vmul.f32 %v1336_v3, %v429_v54  ;;  %v756_v62 = vpop.eup %755 }
  0x62   :  { %767 = vlog2.f32 %v434_v6  ;;  %v449_v9 = vand.u32 2147483647, %v1349_v42  ;;  %v589_v13 = vadd.f32 %v325_v61, %v1934_v29  ;;  %v343_v47 = vsel %vm1443_vm5, %v1374_v38, %v337_v25  ;;  %v1938_v6 = vld [vmem:[#allocation12_spill] sm:$0xff]  ;;  %v758_v29 = vpop.eup %757 }
  0x63   :  { %v355_v19 = vmul.f32 0.6931472, %v750_v43  ;;  %769 = vlog2.f32 %v443_v23  ;;  %v447_v57 = vadd.f32 1.0, %v446_v21  ;;  %v364_v37 = vmul.f32 0.6931472, %v752_v44  ;;  %v760_v21 = vpop.eup %759 }
  0x64   :  { %v1935_v53 = vand.u32 2147483647, %v1327_v39  ;;  %771 = vlog2.f32 %v452_v28  ;;  %v590_v54 = vadd.f32 %v334_v50, %v1938_v6  ;;  %v626_v61 = vadd.f32 %v588_v2, %v587_v20 }
  0x65   :  { %v352_v34 = vsel %vm1457_vm6, %v1385_v63, %v346_v5  ;;  %vm1549_vm14 = vcmp.lt.f32.partialorder %v422_v27, 0.0004427343  ;;  %v1554_v23 = vmul.f32 %v1343_v41, %v438_v52  ;;  %v456_v39 = vadd.f32 1.0, %v455_v36  ;;  %v1943_v63 = vld [vmem:[#allocation13_spill] sm:$0xff] }
  0x66   :  { %vm1541_vm13 = vcmp.lt.f32.partialorder %v1935_v53, 0.0004427343  ;;  %v464_v25 = vmul.f32 -0.5, %v1360_v48  ;;  %vm1557_vm15 = vcmp.lt.f32.partialorder %v431_v7, 0.0004427343  ;;  %v461_v15 = vadd.f32 1.0, %v1360_v48  ;;  %v762_v7 = vpop.eup %761 }
  0x67   :  { %v458_v28 = vand.u32 2147483647, %v1353_v11  ;;  %v591_v27 = vadd.f32 %v343_v47, %v1943_v63  ;;  %v627_v20 = vadd.f32 %v626_v61, %v589_v13  ;;  %v361_v41 = vsel %vm1474_vm7, %v1404_v18, %v355_v19  ;;  %v764_v60 = vpop.eup %763 }
  0x68   :  { %v373_v2 = vmul.f32 0.6931472, %v754_v49  ;;  %v382_v36 = vmul.f32 0.6931472, %v756_v62  ;;  %v1568_v44 = vmul.f32 %v1349_v42, %v447_v57  ;;  %v370_v50 = vsel %vm1493_vm8, %v1420_v45, %v364_v37  ;;  %v766_v57 = vpop.eup %765  ;;  %v1959_v45 = vld [vmem:[#allocation31_spill] sm:$0xff] }
  0x69   :  { %v391_v5 = vmul.f32 0.6931472, %v758_v29  ;;  %vm1573_vm1 = vcmp.lt.f32.partialorder %v440_v24, 0.0004427343  ;;  %v592_v13 = vadd.f32 %v352_v34, %v1152_v16  ;;  %v628_v47 = vadd.f32 %v627_v20, %v590_v54 }
  0x6a   :  { %v400_v18 = vmul.f32 0.6931472, %v760_v21  ;;  %v1579_v49 = vmul.f32 %v1353_v11, %v456_v39  ;;  %v465_v42 = vadd.f32 1.0, %v464_v25  ;;  %v473_v19 = vmul.f32 -0.5, %v1364_v56 }
  0x6b   :  { %vm1582_vm2 = vcmp.lt.f32.partialorder %v449_v9, 0.0004427343  ;;  %vm1586_vm3 = vcmp.lt.f32.partialorder %v458_v28, 0.0004427343  ;;  %773 = vlog2.f32 %v461_v15  ;;  %v470_v16 = vadd.f32 1.0, %v1364_v56 }
  0x6c   :  { %v593_v24 = vadd.f32 %v361_v41, %v1159_v26  ;;  %v629_v62 = vadd.f32 %v628_v47, %v591_v27  ;;  %v379_v11 = vsel %vm1508_vm9, %v1425_v14, %v373_v2  ;;  %v388_v9 = vsel %vm1512_vm10, %v1438_v30, %v382_v36  ;;  %v768_v6 = vpop.eup %767 }
  0x6d   :  { %v409_v37 = vmul.f32 0.6931472, %v762_v7  ;;  %v467_v53 = vand.u32 2147483647, %v1360_v48  ;;  %v397_v54 = vsel %vm1522_vm11, %v1448_v4, %v391_v5  ;;  %v418_v61 = vmul.f32 0.6931472, %v764_v60  ;;  %v770_v34 = vpop.eup %769 }
  0x6e   :  { %v594_v26 = vadd.f32 %v370_v50, %v1166_v59  ;;  %v630_v29 = vadd.f32 %v629_v62, %v592_v13  ;;  %v406_v14 = vsel %vm1527_vm12, %v1462_v22, %v400_v18  ;;  %v427_v1 = vmul.f32 0.6931472, %v766_v57  ;;  %v772_v39 = vpop.eup %771  ;;  %v1954_v50 = vld [vmem:[#allocation16_spill] sm:$0xff]  ;;  %v1955_v60 = vld [vmem:[#allocation30_spill] sm:$0xff] }
  0x6f   :  { %v1607_v30 = vmul.f32 %v1360_v48, %v465_v42  ;;  %v474_v0 = vadd.f32 1.0, %v473_v19  ;;  %775 = vlog2.f32 %v470_v16  ;;  %v479_v25 = vadd.f32 1.0, %v1371_v31  ;;  %v1956_v42 = vld [vmem:[#allocation17_spill] sm:$0xff] }
  0x70   :  { %v595_v4 = vadd.f32 %v379_v11, %v1177_v58  ;;  %v631_v35 = vadd.f32 %v630_v29, %v593_v24  ;;  %v415_v59 = vsel %vm1541_vm13, %v1469_v8, %v409_v37  ;;  %v436_v21 = vmul.f32 0.6931472, %v768_v6  ;;  %v1963_v29 = vld [vmem:[#allocation32_spill] sm:$0xff] }
  0x71   :  { %v476_v40 = vand.u32 2147483647, %v1364_v56  ;;  %v482_v22 = vmul.f32 -0.5, %v1371_v31  ;;  %v424_v48 = vsel %vm1549_vm14, %v1479_v12, %v418_v61  ;;  %vm1619_vm4 = vcmp.lt.f32.partialorder %v467_v53, 0.0004427343 }
  0x72   :  { %v488_v58 = vadd.f32 1.0, %v1377_v51  ;;  %v596_v15 = vadd.f32 %v388_v9, %v1181_v46  ;;  %v632_v63 = vadd.f32 %v631_v35, %v594_v26  ;;  %v433_v8 = vsel %vm1557_vm15, %v1532_v55, %v427_v1  ;;  %v1960_v9 = vld [vmem:[#allocation18_spill] sm:$0xff] }
  0x73   :  { %v445_v3 = vmul.f32 0.6931472, %v770_v34  ;;  %v1628_v27 = vmul.f32 0.6931472, %v772_v39  ;;  %v1631_v20 = vmul.f32 %v1364_v56, %v474_v0  ;;  %777 = vlog2.f32 %v479_v25 }
  0x74   :  { %v497_v12 = vadd.f32 1.0, %v1382_v17  ;;  %v597_v38 = vadd.f32 %v397_v54, %v1185_v32  ;;  %v633_v41 = vadd.f32 %v632_v63, %v595_v4  ;;  %v442_v46 = vsel %vm1573_vm1, %v1554_v23, %v436_v21  ;;  %v1965_v21 = vld [vmem:[#allocation33_spill] sm:$0xff] }
  0x75   :  { %v483_v2 = vadd.f32 1.0, %v482_v22  ;;  %v485_v43 = vand.u32 2147483647, %v1371_v31  ;;  %v491_v55 = vmul.f32 -0.5, %v1377_v51  ;;  %v774_v36 = vpop.eup %773  ;;  %vm1640_vm5 = vcmp.lt.f32.partialorder %v476_v40, 0.0004427343 }
  0x76   :  { %779 = vlog2.f32 %v488_v58  ;;  %v506_v56 = vadd.f32 1.0, %v1388_v10  ;;  %v598_v32 = vadd.f32 %v406_v14, %v1954_v50  ;;  %v634_v5 = vadd.f32 %v633_v41, %v596_v15  ;;  %v1964_v14 = vld [vmem:[#allocation19_spill] sm:$0xff]  ;;  %v1966_v22 = vld [vmem:[#allocation20_spill] sm:$0xff] }
  0x77   :  { %v451_v23 = vsel %vm1582_vm2, %v1568_v44, %v445_v3  ;;  %v460_v52 = vsel %vm1586_vm3, %v1579_v49, %v1628_v27  ;;  %v494_v13 = vand.u32 2147483647, %v1377_v51  ;;  %v500_v47 = vmul.f32 -0.5, %v1382_v17  ;;  %v1971_v27 = vld [vmem:[#allocation34_spill] sm:$0xff] }
  0x78   :  { %781 = vlog2.f32 %v497_v12  ;;  %v515_v18 = vadd.f32 1.0, %v1955_v60  ;;  %v599_v19 = vadd.f32 %v415_v59, %v1956_v42  ;;  %v635_v57 = vadd.f32 %v634_v5, %v597_v38  ;;  %v1972_v38 = vld [vmem:[#allocation21_spill] sm:$0xff] }
  0x79   :  { %v463_v16 = vmul.f32 0.6931472, %v774_v36  ;;  %v1658_v24 = vmul.f32 %v1371_v31, %v483_v2  ;;  %v492_v44 = vadd.f32 1.0, %v491_v55  ;;  %v509_v33 = vmul.f32 -0.5, %v1388_v10  ;;  %v776_v62 = vpop.eup %775 }
  0x7a   :  { %vm1661_vm6 = vcmp.lt.f32.partialorder %v485_v43, 0.0004427343  ;;  %783 = vlog2.f32 %v506_v56  ;;  %v524_v11 = vadd.f32 1.0, %v1959_v45  ;;  %v600_v37 = vadd.f32 %v424_v48, %v1960_v9  ;;  %v1975_v56 = vld [vmem:[#allocation35_spill] sm:$0xff] }
  0x7b   :  { %v636_v53 = vadd.f32 %v635_v57, %v598_v32  ;;  %v501_v6 = vadd.f32 1.0, %v500_v47  ;;  %v503_v54 = vand.u32 2147483647, %v1382_v17  ;;  %v512_v31 = vand.u32 2147483647, %v1388_v10  ;;  %v1976_v32 = vld [vmem:[#allocation22_spill] sm:$0xff] }
  0x7c   :  { %v518_v61 = vmul.f32 -0.5, %v1955_v60  ;;  %vm1670_vm7 = vcmp.lt.f32.partialorder %v494_v13, 0.0004427343  ;;  %785 = vlog2.f32 %v515_v18  ;;  %v533_v34 = vadd.f32 1.0, %v1963_v29  ;;  %v1977_v18 = vld [vmem:[#allocation36_spill] sm:$0xff] }
  0x7d   :  { %v601_v1 = vadd.f32 %v433_v8, %v1964_v14  ;;  %v637_v0 = vadd.f32 %v636_v53, %v599_v19  ;;  %v469_v39 = vsel %vm1619_vm4, %v1607_v30, %v463_v16  ;;  %v472_v25 = vmul.f32 0.6931472, %v776_v62  ;;  %v778_v59 = vpop.eup %777  ;;  %v1978_v19 = vld [vmem:[#allocation4_spill] sm:$0xff]  ;;  %v1983_v14 = vld [vmem:[#allocation23_spill] sm:$0xff] }
  0x7e   :  { %v510_v4 = vadd.f32 1.0, %v509_v33  ;;  %v521_v35 = vand.u32 2147483647, %v1955_v60  ;;  %787 = vlog2.f32 %v524_v11  ;;  %v542_v40 = vadd.f32 1.0, %v1965_v21  ;;  %v1979_v11 = vld [vmem:[#allocation37_spill] sm:$0xff] }
  0x7f   :  { %v602_v48 = vadd.f32 %v442_v46, %v1966_v22  ;;  %v638_v58 = vadd.f32 %v637_v0, %v600_v37  ;;  %v493_v15 = vmul.f32 %v1377_v51, %v492_v44  ;;  %v1684_v63 = vmul.f32 %v1382_v17, %v501_v6  ;;  %v1980_v37 = vld [vmem:[#allocation3_spill] sm:$0xff] }
  0x80   :  { %vm1686_vm8 = vcmp.lt.f32.partialorder %v503_v54, 0.0004427343  ;;  %v519_v30 = vadd.f32 1.0, %v518_v61  ;;  %v780_v28 = vpop.eup %779  ;;  %vm1690_vm9 = vcmp.lt.f32.partialorder %v512_v31, 0.0004427343  ;;  %789 = vlog2.f32 %v533_v34 }
  0x81   :  { %v551_v12 = vadd.f32 1.0, %v1971_v27  ;;  %v603_v41 = vadd.f32 %v451_v23, %v1972_v38  ;;  %v639_v46 = vadd.f32 %v638_v58, %v601_v1  ;;  %v478_v51 = vsel %vm1640_vm5, %v1631_v20, %v472_v25 }
  0x82   :  { %v481_v17 = vmul.f32 0.6931472, %v778_v59  ;;  %v511_v2 = vmul.f32 %v1388_v10, %v510_v4  ;;  %v527_v43 = vmul.f32 -0.5, %v1959_v45  ;;  %v782_v55 = vpop.eup %781  ;;  %vm1701_vm10 = vcmp.lt.f32.partialorder %v521_v35, 0.0004427343 }
  0x83   :  { %791 = vlog2.f32 %v542_v40  ;;  %v560_v50 = vadd.f32 1.0, %v1975_v56  ;;  %v604_v5 = vadd.f32 %v460_v52, %v1976_v32  ;;  %v640_v23 = vadd.f32 %v639_v46, %v602_v48  ;;  %v1984_v40 = vld [vmem:[#allocation5_spill] sm:$0xff] }
  0x84   :  { %v490_v13 = vmul.f32 0.6931472, %v780_v28  ;;  %v520_v7 = vmul.f32 %v1955_v60, %v519_v30  ;;  %v530_v20 = vand.u32 2147483647, %v1959_v45  ;;  %v536_v10 = vmul.f32 -0.5, %v1963_v29  ;;  %v784_v47 = vpop.eup %783 }
  0x85   :  { %793 = vlog2.f32 %v551_v12  ;;  %v569_v42 = vadd.f32 1.0, %v1977_v18  ;;  %v605_v57 = vadd.f32 %v469_v39, %v1978_v19  ;;  %v641_v16 = vadd.f32 %v640_v23, %v603_v41  ;;  %v1987_v12 = vld [vmem:[#allocation2_spill] sm:$0xff] }
  0x86   :  { %v487_v44 = vsel %vm1661_vm6, %v1658_v24, %v481_v17  ;;  %v499_v52 = vmul.f32 0.6931472, %v782_v55  ;;  %v528_v33 = vadd.f32 1.0, %v527_v43  ;;  %v545_v62 = vmul.f32 -0.5, %v1965_v21  ;;  %v786_v60 = vpop.eup %785 }
  0x87   :  { %795 = vlog2.f32 %v560_v50  ;;  %v578_v9 = vadd.f32 1.0, %v1979_v11  ;;  %v606_v53 = vadd.f32 %v478_v51, %v1980_v37  ;;  %v642_v6 = vadd.f32 %v641_v16, %v604_v5  ;;  %v1988_v50 = vld [vmem:[#allocation24_spill] sm:$0xff] }
  0x88   :  { %v496_v54 = vsel %vm1670_vm7, %v493_v15, %v490_v13  ;;  %v508_v31 = vmul.f32 0.6931472, %v784_v47  ;;  %vm1720_vm11 = vcmp.lt.f32.partialorder %v530_v20, 0.0004427343  ;;  %v539_v24 = vand.u32 2147483647, %v1963_v29  ;;  %v788_v49 = vpop.eup %787 }
  0x89   :  { %v537_v34 = vadd.f32 1.0, %v536_v10  ;;  %797 = vlog2.f32 %v569_v42  ;;  %v607_v1 = vadd.f32 %v487_v44, %v1983_v14  ;;  %v643_v0 = vadd.f32 %v642_v6, %v605_v57 }
  0x8a   :  { %v505_v39 = vsel %vm1686_vm8, %v1684_v63, %v499_v52  ;;  %v517_v25 = vmul.f32 0.6931472, %v786_v60  ;;  %v529_v26 = vmul.f32 %v1959_v45, %v528_v33  ;;  %v554_v4 = vmul.f32 -0.5, %v1971_v27  ;;  %v790_v35 = vpop.eup %789  ;;  %v74_v33 = vld [vmem:[%s1813_s1 + $0xf8] sm:$0xff] }
  0x8b   :  { %v546_v59 = vadd.f32 1.0, %v545_v62  ;;  %799 = vlog2.f32 %v578_v9  ;;  %v608_v22 = vadd.f32 %v496_v54, %v1984_v40  ;;  %v644_v48 = vadd.f32 %v643_v0, %v606_v53  ;;  %v1994_v9 = vld [vmem:[#allocation26_spill] sm:$0xff]  ;;  %v801_v0 = vld [vmem:[%s1811_s0 + $0xf8] sm:$0xff] }
  0x8c   :  { %v514_v58 = vsel %vm1690_vm9, %v511_v2, %v508_v31  ;;  %v526_v15 = vmul.f32 0.6931472, %v788_v49  ;;  %vm1734_vm12 = vcmp.lt.f32.partialorder %v539_v24, 0.0004427343  ;;  %v563_v63 = vmul.f32 -0.5, %v1975_v56 }
  0x8d   :  { %v792_v8 = vpop.eup %791  ;;  %v538_v45 = vmul.f32 %v1963_v29, %v537_v34  ;;  %v548_v28 = vand.u32 2147483647, %v1965_v21  ;;  %v609_v38 = vadd.f32 %v505_v39, %v1987_v12  ;;  %v645_v41 = vadd.f32 %v644_v48, %v607_v1  ;;  %v1997_v34 = vld [vmem:[#allocation27_spill] sm:$0xff] }
  0x8e   :  { %v523_v46 = vsel %vm1701_vm10, %v520_v7, %v517_v25  ;;  %v535_v3 = vmul.f32 0.6931472, %v790_v35  ;;  %v555_v51 = vadd.f32 1.0, %v554_v4  ;;  %v572_v17 = vmul.f32 -0.5, %v1977_v18  ;;  %v1998_v4 = vld [vmem:[#allocation14_spill] sm:$0xff] }
  0x8f   :  { %v794_v2 = vpop.eup %793  ;;  %v547_v43 = vmul.f32 %v1965_v21, %v546_v59  ;;  %v557_v55 = vand.u32 2147483647, %v1971_v27  ;;  %v610_v32 = vadd.f32 %v514_v58, %v1988_v50  ;;  %v646_v29 = vadd.f32 %v645_v41, %v608_v22  ;;  %v1991_v21 = vld [vmem:[#allocation25_spill] sm:$0xff]  ;;  %v1999_v35 = vld [vmem:[#allocation6_spill] sm:$0xff]  ;;  %v2001_v22 = vld [vmem:[#allocation28_spill] sm:$0xff] }
  0x90   :  { %v532_v5 = vsel %vm1720_vm11, %v529_v26, %v526_v15  ;;  %v544_v23 = vmul.f32 0.6931472, %v792_v8  ;;  %v564_v13 = vadd.f32 1.0, %v563_v63  ;;  %v581_v36 = vmul.f32 -0.5, %v1979_v11  ;;  %v2002_v8 = vld [vmem:[#allocation15_spill] sm:$0xff] }
  0x91   :  { %v796_v7 = vpop.eup %795  ;;  %vm1751_vm13 = vcmp.lt.f32.partialorder %v548_v28, 0.0004427343  ;;  %v566_v10 = vand.u32 2147483647, %v1975_v56  ;;  %v611_v47 = vadd.f32 %v523_v46, %v1991_v21  ;;  %v647_v42 = vadd.f32 %v646_v29, %v609_v38 }
  0x92   :  { %v541_v19 = vsel %vm1734_vm12, %v538_v45, %v535_v3  ;;  %v553_v57 = vmul.f32 0.6931472, %v794_v2  ;;  %v556_v16 = vmul.f32 %v1971_v27, %v555_v51  ;;  %v573_v44 = vadd.f32 1.0, %v572_v17  ;;  %v2003_v45 = vld [vmem:[#allocation7_spill] sm:$0xff]  ;;  %v2006_v3 = vld [vmem:[#allocation8_spill] sm:$0xff] }
  0x93   :  { %v798_v52 = vpop.eup %797  ;;  %vm1763_vm14 = vcmp.lt.f32.partialorder %v557_v55, 0.0004427343  ;;  %v575_v60 = vand.u32 2147483647, %v1977_v18  ;;  %v612_v37 = vadd.f32 %v532_v5, %v1994_v9  ;;  %v648_v53 = vadd.f32 %v647_v42, %v610_v32 }
  0x94   :  { %v550_v6 = vsel %vm1751_vm13, %v547_v43, %v544_v23  ;;  %v562_v54 = vmul.f32 0.6931472, %v796_v7  ;;  %v565_v27 = vmul.f32 %v1975_v56, %v564_v13  ;;  %v582_v31 = vadd.f32 1.0, %v581_v36  ;;  %v625_v13 = vld [vmem:[%s1812_s2] sm:$0xff] }
  0x95   :  { %v800_v61 = vpop.eup %799  ;;  %vm1772_vm15 = vcmp.lt.f32.partialorder %v566_v10, 0.0004427343  ;;  %v584_v49 = vand.u32 2147483647, %v1979_v11  ;;  %v613_v14 = vadd.f32 %v541_v19, %v1997_v34  ;;  %v649_v1 = vadd.f32 %v648_v53, %v611_v47 }
  0x96   :  { %v138_v39 = vmul.f32 %v801_v0, %v74_v33  ;;  %v559_v25 = vsel %vm1763_vm14, %v556_v16, %v553_v57  ;;  %v571_v56 = vmul.f32 0.6931472, %v798_v52  ;;  %v574_v26 = vmul.f32 %v1977_v18, %v573_v44  ;;  %v2005_v18 = vld [vmem:[#allocation29_spill] sm:$0xff] }
  0x97   :  { %v2000_v59 = vmax.f32 %v1999_v35, 0.0  ;;  %vm576_vm1 = vcmp.lt.f32.partialorder %v575_v60, 0.0004427343  ;;  %v614_v48 = vadd.f32 %v550_v6, %v2001_v22  ;;  %v650_v58 = vadd.f32 %v649_v1, %v612_v37 }
  0x98   :  { %v568_v15 = vsel %vm1772_vm15, %v565_v27, %v562_v54  ;;  %v580_v30 = vmul.f32 0.6931472, %v800_v61  ;;  %v583_v63 = vmul.f32 %v1979_v11, %v582_v31  ;;  %v2004_v28 = vmax.f32 %v2003_v45, 0.0 }
  0x99   :  { %v168_v40 = vsub.f32 %v2000_v59, %v1998_v4  ;;  %vm585_vm2 = vcmp.lt.f32.partialorder %v584_v49, 0.0004427343  ;;  %v615_v38 = vadd.f32 %v559_v25, %v2005_v18  ;;  %v651_v41 = vadd.f32 %v650_v58, %v613_v14 }
  0x9a   :  { %v169_v12 = vsub.f32 %v2004_v28, %v2002_v8  ;;  %v577_v46 = vsel %vm576_vm1, %v574_v26, %v571_v56  ;;  %v2007_v51 = vmax.f32 %v2006_v3, 0.0  ;;  %v586_v55 = vsel %vm585_vm2, %v583_v63, %v580_v30 }
  0x9b   :  { %v616_v2 = vadd.f32 %v568_v15, %v168_v40  ;;  %v652_v43 = vadd.f32 %v651_v41, %v614_v48 }
  0x9c   :  { %v170_v17 = vsub.f32 %v2007_v51, %v138_v39  ;;  %v617_v50 = vadd.f32 %v577_v46, %v169_v12 }
  0x9d   :  { %v653_v32 = vadd.f32 %v652_v43, %v615_v38 }
  0x9e   :  { %v618_v29 = vadd.f32 %v586_v55, %v170_v17 }
  0x9f   :  { %v654_v5 = vadd.f32 %v653_v32, %v616_v2 }
  0xa1   :  { %v655_v11 = vadd.f32 %v654_v5, %v617_v50 }
  0xa3   :  { %v656_v23 = vadd.f32 %v655_v11, %v618_v29 }
  0xa5   :  { %657 = vadd.xlane.f32.xlu0 %v656_v23 }
 0x132   :  { %v658_v36 = vpop.xlane.xlu0 %657 }
 0x133   :  { %v659_v7 = vadd.f32 %v658_v36, %v625_v13 }
 0x135   :  { %661 = vst.msk [vmem:[%s1812_s2] sm:$0xff] %vm623_vm0, %v659_v7 }
 0x13c   :  { %v665_v20 = vld [vmem:[%s1812_s2] sm:$0xff] }
 0x13d   :  { %v666_v10 = vmul.f32 0.00024414063, %v665_v20 }
 0x13f   :  { %667 = vst.msk [vmem:[%s1812_s2] sm:$0xff] %vm623_vm0, %v666_v10 }

</bundles_post_ra>
